<compile_context>
chip_gen: v5e
topology: v5e:2x2
jax: 0.10.0
libtpu: 0.0.40
codegen_flags: <defaults>
</compile_context>

<pallas_src>
import jax
import jax.numpy as jnp
from jax.experimental import pallas as pl
from jax.experimental.pallas import tpu as pltpu

ENTROPY_WEIGHT = 2.0
EPS = 1e-8
_OUT_LANES = 128                      # lane-dense scalar output slab
_INPUT_VMEM_BUDGET = 4 * 1024 * 1024  # bytes for 2 inputs x 2 pipeline buffers
_MAX_TILE_B = 2048
_MIN_TILE_B = 8


def _make_kernel(true_b: int, entropy_weight: float, needs_mask: bool):
    inv_b = 1.0 / float(true_b)

    def kernel(anchors_ref, neighbors_ref, out_ref, prob_sum, logsim_sum):
        i = pl.program_id(0)
        tb = anchors_ref.shape[0]

        @pl.when(i == 0)
        def _init():
            prob_sum[...] = jnp.zeros_like(prob_sum)
            logsim_sum[...] = jnp.zeros_like(logsim_sum)

        a = anchors_ref[...].astype(jnp.float32)    # [tb, n]
        g = neighbors_ref[...].astype(jnp.float32)  # [tb, n]

        if needs_mask:
            # Rows of the last partial block may be out of bounds (undefined
            # data).  Zero them *before* exp/log so no Inf/NaN can appear,
            # then zero their contributions to both accumulators.
            row = i * tb + jax.lax.broadcasted_iota(jnp.int32, (tb, 1), 0)
            valid_b = row < true_b                         # [tb, 1] bool
            valid = valid_b.astype(jnp.float32)
            a = jnp.where(valid_b, a, 0.0)
            g = jnp.where(valid_b, g, 0.0)

        # ---- anchors softmax (numerically stable), dim=1 ----
        a_max = jnp.max(a, axis=1, keepdims=True)
        a_exp = jnp.exp(a - a_max)
        a_sum = jnp.sum(a_exp, axis=1, keepdims=True)
        a_prob = a_exp * pl.reciprocal(a_sum, approx=False)

        # ---- neighbors: skip full normalization, only row sum is needed ----
        g_max = jnp.max(g, axis=1, keepdims=True)
        g_exp = jnp.exp(g - g_max)
        g_sum = jnp.sum(g_exp, axis=1, keepdims=True)

        # similarity = <a_prob, g_prob> per row = sum(a_prob * g_exp) / g_sum
        sim = jnp.sum(a_prob * g_exp, axis=1, keepdims=True) * pl.reciprocal(
            g_sum, approx=False)                           # [tb, 1]
        # BCE with target 1: -log(sim); torch clamps log at -100
        log_sim = jnp.maximum(jnp.log(sim), -100.0)        # [tb, 1]

        if needs_mask:
            log_sim = log_sim * valid
            a_prob = a_prob * valid

        logsim_sum[...] += jnp.sum(log_sim, axis=0, keepdims=True)  # [1, 1]
        prob_sum[...] += jnp.sum(a_prob, axis=0, keepdims=True)     # [1, n]

        @pl.when(i == pl.num_programs(0) - 1)
        def _finalize():
            consistency = -(logsim_sum[...] * inv_b)                # [1, 1]
            mean_prob = prob_sum[...] * inv_b                       # [1, n]
            p = jnp.maximum(mean_prob, EPS)
            ent = -jnp.sum(p * jnp.log(p), axis=1, keepdims=True)   # [1, 1]
            total = consistency - entropy_weight * ent              # [1, 1]

            lane = jax.lax.broadcasted_iota(jnp.int32, out_ref.shape, 1)
            vec = jnp.where(lane == 0, total,
                  jnp.where(lane == 1, consistency,
                  jnp.where(lane == 2, ent, 0.0)))
            out_ref[...] = vec.astype(out_ref.dtype)

    return kernel


def _pick_tile(b: int, n: int, tile_b):
    """Largest multiple-of-8 batch tile that keeps the double-buffered inputs
    under the VMEM budget; a batch that fits in one tile uses the full extent
    (no padding / masking needed even when b % 8 != 0)."""
    cap = _INPUT_VMEM_BUDGET // (16 * n)           # 2 inputs x 2 bufs x 4 B
    cap = max(_MIN_TILE_B, min(_MAX_TILE_B, (cap // 8) * 8))
    if tile_b is not None:
        cap = max(_MIN_TILE_B, min(cap, (int(tile_b) // 8) * 8))
    if b <= cap:
        return b
    return cap


def scan_loss(anchors, neighbors, *, entropy_weight=ENTROPY_WEIGHT, tile_b=None):
    """anchors, neighbors: [b, num_classes] logits (any float dtype).

    Returns (total_loss, consistency_loss, entropy_loss) as f32 scalars.
    """
    b, n = anchors.shape
    tb = _pick_tile(b, n, tile_b)
    nsteps = pl.cdiv(b, tb)
    needs_mask = (b % tb) != 0

    out = pl.pallas_call(
        _make_kernel(b, float(entropy_weight), needs_mask),
        out_shape=jax.ShapeDtypeStruct((1, _OUT_LANES), jnp.float32),
        grid_spec=pltpu.PrefetchScalarGridSpec(
            num_scalar_prefetch=0,
            grid=(nsteps,),
            in_specs=[
                pl.BlockSpec((tb, n), lambda i: (i, 0)),
                pl.BlockSpec((tb, n), lambda i: (i, 0)),
            ],
            out_specs=pl.BlockSpec((1, _OUT_LANES), lambda i: (0, 0)),
            scratch_shapes=[
                pltpu.VMEM((1, n), jnp.float32),   # sum of anchors_prob rows
                pltpu.VMEM((1, 1), jnp.float32),   # sum of clamped log(sim)
            ],
        ),
        compiler_params=pltpu.CompilerParams(
            dimension_semantics=("arbitrary",)),
    )(anchors, neighbors)

    return out[0, 0], out[0, 1], out[0, 2]


def _reference(anchors, neighbors, entropy_weight=ENTROPY_WEIGHT):
    a_prob = jax.nn.softmax(anchors.astype(jnp.float32), axis=1)
    g_prob = jax.nn.softmax(neighbors.astype(jnp.float32), axis=1)
    sim = jnp.sum(a_prob * g_prob, axis=1)
    consistency = -jnp.mean(jnp.maximum(jnp.log(sim), -100.0))
    p = jnp.maximum(jnp.mean(a_prob, axis=0), EPS)
    ent = -jnp.sum(p * jnp.log(p))
    total = consistency - entropy_weight * ent
    return total, consistency, ent


if __name__ == "__main__":
    key = jax.random.PRNGKey(0)

    # (batch, num_classes, tile_b, dtype) — covers: single exact tile,
    # single non-8-aligned full-extent tile, multi-step accumulator with exact
    # tiling, masked partial last tile, and bf16 logits.
    cases = [
        (8, 16, None, jnp.float32),
        (13, 10, None, jnp.float32),
        (24, 16, 8, jnp.float32),
        (13, 10, 8, jnp.float32),
        (30, 16, 8, jnp.bfloat16),
    ]
    for batch, num_classes, tb, dtype in cases:
        key, k1, k2 = jax.random.split(key, 3)
        anchors = jax.random.normal(
            k1, (batch, num_classes), dtype=jnp.float32).astype(dtype)
        neighbors = jax.random.normal(
            k2, (batch, num_classes), dtype=jnp.float32).astype(dtype)

        total, cons, ent = jax.block_until_ready(
            scan_loss(anchors, neighbors, tile_b=tb))
        ref_total, ref_cons, ref_ent = _reference(anchors, neighbors)

        assert jnp.allclose(total, ref_total, atol=1e-5, rtol=1e-5), \
            (batch, num_classes, tb, total, ref_total)
        assert jnp.allclose(cons, ref_cons, atol=1e-5, rtol=1e-5), \
            (batch, num_classes, tb, cons, ref_cons)
        assert jnp.allclose(ent, ref_ent, atol=1e-5, rtol=1e-5), \
            (batch, num_classes, tb, ent, ref_ent)

    print("KERNEL_OK")
</pallas_src>

<mosaic_0001>
module attributes {stable_mosaic.version = 11 : i64} {
  func.func @kernel(%arg0: i32, %arg1: memref<8x16xf32, #tpu.memory_space<vmem>>, %arg2: memref<8x16xf32, #tpu.memory_space<vmem>>, %arg3: memref<1x128xf32, #tpu.memory_space<vmem>>, %arg4: memref<1x16xf32, #tpu.memory_space<vmem>>, %arg5: memref<1x1xf32, #tpu.memory_space<vmem>>) attributes {dimension_semantics = [#tpu.dimension_semantics<arbitrary>], iteration_bounds = array<i64: 1>, scalar_prefetch = 0 : i64, scratch_operands = 2 : i64, tpu.core_type = #tpu.core_type<tc>, window_params = [{transform_indices = @transform_0, window_bounds = array<i64: 8, 16>}, {transform_indices = @transform_1, window_bounds = array<i64: 8, 16>}, {pipeline_mode = #tpu.pipeline_mode<synchronous>, transform_indices = @transform_2, window_bounds = array<i64: 1, 128>}]} {
    %c0_i32 = arith.constant 0 : i32
    %0 = arith.cmpi eq, %arg0, %c0_i32 : i32
    %1 = arith.extui %0 : i1 to i32
    %c0_i32_0 = arith.constant 0 : i32
    %2 = arith.cmpi ne, %1, %c0_i32_0 : i32
    scf.if %2 {
      %cst_21 = arith.constant 0.000000e+00 : f32
      %43 = vector.broadcast %cst_21 : f32 to vector<1x16xf32>
      %c0_22 = arith.constant 0 : index
      %c0_23 = arith.constant 0 : index
      %44 = vector.load %arg4[%c0_22, %c0_23] : memref<1x16xf32, #tpu.memory_space<vmem>>, vector<1x16xf32>
      tpu.vector_store %arg4[%c0_22, %c0_23], %43 {strides = array<i32>} : memref<1x16xf32, #tpu.memory_space<vmem>>, vector<1x16xf32>,
      %cst_24 = arith.constant 0.000000e+00 : f32
      %45 = vector.broadcast %cst_24 : f32 to vector<1x1xf32>
      %c0_25 = arith.constant 0 : index
      %c0_26 = arith.constant 0 : index
      %46 = vector.load %arg5[%c0_25, %c0_26] : memref<1x1xf32, #tpu.memory_space<vmem>>, vector<1x1xf32>
      tpu.vector_store %arg5[%c0_25, %c0_26], %45 {strides = array<i32>} : memref<1x1xf32, #tpu.memory_space<vmem>>, vector<1x1xf32>,
    } else {
    }
    %c0 = arith.constant 0 : index
    %c0_1 = arith.constant 0 : index
    %3 = vector.load %arg1[%c0, %c0_1] : memref<8x16xf32, #tpu.memory_space<vmem>>, vector<8x16xf32>
    %c0_2 = arith.constant 0 : index
    %c0_3 = arith.constant 0 : index
    %4 = vector.load %arg2[%c0_2, %c0_3] : memref<8x16xf32, #tpu.memory_space<vmem>>, vector<8x16xf32>
    %cst = arith.constant dense<0xFF800000> : vector<8xf32>
    %5 = vector.multi_reduction <maximumf>, %3, %cst [1] : vector<8x16xf32> to vector<8xf32>
    %6 = vector.shape_cast %5 : vector<8xf32> to vector<8x1xf32>
    %7 = vector.broadcast %6 : vector<8x1xf32> to vector<8x16xf32>
    %8 = arith.subf %3, %7 : vector<8x16xf32>
    %9 = math.exp %8 : vector<8x16xf32>
    %cst_4 = arith.constant dense<0.000000e+00> : vector<8xf32>
    %10 = vector.multi_reduction <add>, %9, %cst_4 [1] : vector<8x16xf32> to vector<8xf32>
    %11 = vector.shape_cast %10 : vector<8xf32> to vector<8x1xf32>
    %12 = tpu.reciprocal %11 : vector<8x1xf32> -> vector<8x1xf32>
    %13 = vector.broadcast %12 : vector<8x1xf32> to vector<8x16xf32>
    %14 = arith.mulf %9, %13 : vector<8x16xf32>
    %cst_5 = arith.constant dense<0xFF800000> : vector<8xf32>
    %15 = vector.multi_reduction <maximumf>, %4, %cst_5 [1] : vector<8x16xf32> to vector<8xf32>
    %16 = vector.shape_cast %15 : vector<8xf32> to vector<8x1xf32>
    %17 = vector.broadcast %16 : vector<8x1xf32> to vector<8x16xf32>
    %18 = arith.subf %4, %17 : vector<8x16xf32>
    %19 = math.exp %18 : vector<8x16xf32>
    %cst_6 = arith.constant dense<0.000000e+00> : vector<8xf32>
    %20 = vector.multi_reduction <add>, %19, %cst_6 [1] : vector<8x16xf32> to vector<8xf32>
    %21 = vector.shape_cast %20 : vector<8xf32> to vector<8x1xf32>
    %22 = arith.mulf %14, %19 : vector<8x16xf32>
    %cst_7 = arith.constant dense<0.000000e+00> : vector<8xf32>
    %23 = vector.multi_reduction <add>, %22, %cst_7 [1] : vector<8x16xf32> to vector<8xf32>
    %24 = vector.shape_cast %23 : vector<8xf32> to vector<8x1xf32>
    %25 = tpu.reciprocal %21 : vector<8x1xf32> -> vector<8x1xf32>
    %26 = arith.mulf %24, %25 : vector<8x1xf32>
    %27 = math.log %26 : vector<8x1xf32>
    %cst_8 = arith.constant -1.000000e+02 : f32
    %28 = vector.broadcast %cst_8 : f32 to vector<8x1xf32>
    %29 = arith.maximumf %27, %28 : vector<8x1xf32>
    %c0_9 = arith.constant 0 : index
    %c0_10 = arith.constant 0 : index
    %30 = vector.load %arg5[%c0_9, %c0_10] : memref<1x1xf32, #tpu.memory_space<vmem>>, vector<1x1xf32>
    %cst_11 = arith.constant dense<0.000000e+00> : vector<1xf32>
    %31 = vector.multi_reduction <add>, %29, %cst_11 [0] : vector<8x1xf32> to vector<1xf32>
    %32 = vector.shape_cast %31 : vector<1xf32> to vector<1x1xf32>
    %33 = arith.addf %30, %32 : vector<1x1xf32>
    %c0_12 = arith.constant 0 : index
    %c0_13 = arith.constant 0 : index
    %34 = vector.load %arg5[%c0_12, %c0_13] : memref<1x1xf32, #tpu.memory_space<vmem>>, vector<1x1xf32>
    tpu.vector_store %arg5[%c0_12, %c0_13], %33 {strides = array<i32>} : memref<1x1xf32, #tpu.memory_space<vmem>>, vector<1x1xf32>,
    %c0_14 = arith.constant 0 : index
    %c0_15 = arith.constant 0 : index
    %35 = vector.load %arg4[%c0_14, %c0_15] : memref<1x16xf32, #tpu.memory_space<vmem>>, vector<1x16xf32>
    %cst_16 = arith.constant dense<0.000000e+00> : vector<16xf32>
    %36 = vector.multi_reduction <add>, %14, %cst_16 [0] : vector<8x16xf32> to vector<16xf32>
    %37 = vector.shape_cast %36 : vector<16xf32> to vector<1x16xf32>
    %38 = arith.addf %35, %37 : vector<1x16xf32>
    %c0_17 = arith.constant 0 : index
    %c0_18 = arith.constant 0 : index
    %39 = vector.load %arg4[%c0_17, %c0_18] : memref<1x16xf32, #tpu.memory_space<vmem>>, vector<1x16xf32>
    tpu.vector_store %arg4[%c0_17, %c0_18], %38 {strides = array<i32>} : memref<1x16xf32, #tpu.memory_space<vmem>>, vector<1x16xf32>,
    %c0_i32_19 = arith.constant 0 : i32
    %40 = arith.cmpi eq, %arg0, %c0_i32_19 : i32
    %41 = arith.extui %40 : i1 to i32
    %c0_i32_20 = arith.constant 0 : i32
    %42 = arith.cmpi ne, %41, %c0_i32_20 : i32
    scf.if %42 {
      %c0_21 = arith.constant 0 : index
      %c0_22 = arith.constant 0 : index
      %43 = vector.load %arg5[%c0_21, %c0_22] : memref<1x1xf32, #tpu.memory_space<vmem>>, vector<1x1xf32>
      %cst_23 = arith.constant 1.250000e-01 : f32
      %44 = vector.broadcast %cst_23 : f32 to vector<1x1xf32>
      %45 = arith.mulf %43, %44 : vector<1x1xf32>
      %cst_24 = arith.constant 0.000000e+00 : f32
      %46 = vector.broadcast %cst_24 : f32 to vector<1x1xf32>
      %47 = arith.subf %46, %45 : vector<1x1xf32>
      %c0_25 = arith.constant 0 : index
      %c0_26 = arith.constant 0 : index
      %48 = vector.load %arg4[%c0_25, %c0_26] : memref<1x16xf32, #tpu.memory_space<vmem>>, vector<1x16xf32>
      %cst_27 = arith.constant 1.250000e-01 : f32
      %49 = vector.broadcast %cst_27 : f32 to vector<1x16xf32>
      %50 = arith.mulf %48, %49 : vector<1x16xf32>
      %cst_28 = arith.constant 9.99999993E-9 : f32
      %51 = vector.broadcast %cst_28 : f32 to vector<1x16xf32>
      %52 = arith.maximumf %50, %51 : vector<1x16xf32>
      %53 = math.log %52 : vector<1x16xf32>
      %54 = arith.mulf %52, %53 : vector<1x16xf32>
      %cst_29 = arith.constant dense<0.000000e+00> : vector<1xf32>
      %55 = vector.multi_reduction <add>, %54, %cst_29 [1] : vector<1x16xf32> to vector<1xf32>
      %56 = vector.shape_cast %55 : vector<1xf32> to vector<1x1xf32>
      %cst_30 = arith.constant 0.000000e+00 : f32
      %57 = vector.broadcast %cst_30 : f32 to vector<1x1xf32>
      %58 = arith.subf %57, %56 : vector<1x1xf32>
      %cst_31 = arith.constant 2.000000e+00 : f32
      %59 = vector.broadcast %cst_31 : f32 to vector<1x1xf32>
      %60 = arith.mulf %59, %58 : vector<1x1xf32>
      %61 = arith.subf %47, %60 : vector<1x1xf32>
      %62 = tpu.iota {dimensions = array<i32: 1>} : vector<1x128xi32>
      %c0_i32_32 = arith.constant 0 : i32
      %63 = vector.broadcast %c0_i32_32 : i32 to vector<1x128xi32>
      %64 = arith.cmpi eq, %62, %63 : vector<1x128xi32>
      %c1_i32 = arith.constant 1 : i32
      %65 = vector.broadcast %c1_i32 : i32 to vector<1x128xi32>
      %66 = arith.cmpi eq, %62, %65 : vector<1x128xi32>
      %c2_i32 = arith.constant 2 : i32
      %67 = vector.broadcast %c2_i32 : i32 to vector<1x128xi32>
      %68 = arith.cmpi eq, %62, %67 : vector<1x128xi32>
      %cst_33 = arith.constant 0.000000e+00 : f32
      %69 = vector.shape_cast %58 : vector<1x1xf32> to vector<1x1xf32>
      %70 = vector.broadcast %69 : vector<1x1xf32> to vector<1x128xf32>
      %71 = vector.broadcast %cst_33 : f32 to vector<1x128xf32>
      %72 = arith.select %68, %70, %71 : vector<1x128xi1>, vector<1x128xf32>
      %73 = vector.shape_cast %47 : vector<1x1xf32> to vector<1x1xf32>
      %74 = vector.broadcast %73 : vector<1x1xf32> to vector<1x128xf32>
      %75 = arith.select %66, %74, %72 : vector<1x128xi1>, vector<1x128xf32>
      %76 = vector.shape_cast %61 : vector<1x1xf32> to vector<1x1xf32>
      %77 = vector.broadcast %76 : vector<1x1xf32> to vector<1x128xf32>
      %78 = arith.select %64, %77, %75 : vector<1x128xi1>, vector<1x128xf32>
      %c0_34 = arith.constant 0 : index
      %c0_35 = arith.constant 0 : index
      %79 = vector.load %arg3[%c0_34, %c0_35] : memref<1x128xf32, #tpu.memory_space<vmem>>, vector<1x128xf32>
      tpu.vector_store %arg3[%c0_34, %c0_35], %78 {strides = array<i32>} : memref<1x128xf32, #tpu.memory_space<vmem>>, vector<1x128xf32>,
    } else {
    }
    return
  }
  func.func @transform_0(%arg0: i32) -> (i32, i32) {
    %c0_i32 = arith.constant 0 : i32
    %c0_i32_0 = arith.constant 0 : i32
    return %arg0, %c0_i32 : i32, i32
  }
  func.func @transform_1(%arg0: i32) -> (i32, i32) {
    %c0_i32 = arith.constant 0 : i32
    %c0_i32_0 = arith.constant 0 : i32
    return %arg0, %c0_i32 : i32, i32
  }
  func.func @transform_2(%arg0: i32) -> (i32, i32) {
    %c0_i32 = arith.constant 0 : i32
    %c0_i32_0 = arith.constant 0 : i32
    %c0_i32_1 = arith.constant 0 : i32
    return %c0_i32, %c0_i32_0 : i32, i32
  }
}

</mosaic_0001>

<bundles_post_ra>
// kernel: tpu_custom_call.1
= control target key start
LH: loop header
LB: loop body
LE: loop exit
PB: predicated region body
PF: predicated region fallthrough
CT: control target
= control target key end

     0   :  { %7 = vsyncpa [#allocation5], 0  ;;  %s321_s0 = inlined_call_operand.hbm [shape: f32[8,16], index: 0, kind: input, shape index: {}]   ;;  %s322_s1 = inlined_call_operand.hbm [shape: f32[8,16], index: 1, kind: input, shape index: {}]   ;;  %s323_s2 = inlined_call_operand.hbm [shape: f32[1,128], index: 2, kind: output, shape index: {}]  }
   0x1   :  { %8 = vsyncpa [#allocation8], 0 }
   0x2   :  { %9 = vsyncpa [#allocation6], 0  ;;  %s15_s11 = sshll.u32 %s321_s0, 4  ;;  %s281_s12 = smov [#allocation4]   ;;  %s16_s11 = int_to_ptr.hbm [resolvable:$true] %s15_s11 }
   0x3   :  { %s17_s13 = sshll.u32 %s281_s12, 4  ;;  %s26_s16 = sshll.u32 %s322_s1, 4  ;;  %s18_s13 = int_to_ptr.vmem [resolvable:$true] %s17_s13  ;;  %s27_s16 = int_to_ptr.hbm [resolvable:$true] %s26_s16 }
   0x4   :  { %20 = dma.hbm_to_vmem [thread:$0]  %s16_s11, 128, %s18_s13, [#allocation5]  }
   0x5   :  { %s282_s17 = smov [#allocation7]  }
   0x6   :  { %s28_s18 = sshll.u32 %s282_s17, 4  ;;  %s29_s18 = int_to_ptr.vmem [resolvable:$true] %s28_s18 }
   0x7   :  { %31 = dma.hbm_to_vmem [thread:$0]  %s27_s16, 128, %s29_s18, [#allocation8]  }
   0x8   :  { %275 = dma.done.wait [#allocation5], 128  }
   0x9   :  { %276 = vsyncadd [#allocation5], 4294967168 }
   0xa   :  { %277 = dma.done.wait [#allocation8], 128  }
   0xb   :  { %278 = vsyncadd [#allocation8], 4294967168  ;;  %vm50_vm0 = vcmask 130048   ;;  %v48_v0 = vld [vmem:[#allocation4] sm:$0xff]  ;;  %v49_v2 = vld [vmem:[#allocation7] sm:$0xff]  ;;  %vm44_vm1 = vcmask 122880  }
   0xc   :  { %v51_v1 = vsel %vm50_vm0, %v48_v0, -inf  ;;  %v75_v3 = vsel %vm50_vm0, %v49_v2, -inf  ;;  %v283_v14 = vmov 0.0   ;;  %vm46_vm2 = vcmask 0   ;;  %s285_s0 = smov [#allocation9]   ;;  %s173_s21 = sshll.u32 %s323_s2, 4  ;;  %s174_s21 = int_to_ptr.hbm [resolvable:$true] %s173_s21 }
   0xd   :  { %52 = vmax.xlane.f32.xlu0 %v51_v1  ;;  %45 = vst.msk [vmem:[#allocation2] sm:$0x1] %vm44_vm1, %v283_v14  ;;  %v284_v58 = vmov 0   ;;  %s171_s1 = sshll.u32 %s285_s0, 4  ;;  %s172_s1 = int_to_ptr.vmem [resolvable:$true] %s171_s1 }
   0xe   :  { %47 = vst.msk [vmem:[#allocation3] sm:$0x1] %vm46_vm2, %v283_v14  ;;  %189 = vset.pattern.permute.xlu0 %v284_v58  ;;  %190 = vset.pattern.permute.xlu1 %v284_v58 }
  0x14   :  { %v116_v35 = vld [vmem:[#allocation2] sm:$0x1] }
  0x15   :  { %76 = vmax.xlane.f32.xlu0 %v75_v3  ;;  %v106_v3 = vld [vmem:[#allocation3] sm:$0x1] }
  0x80   :  { %v53_v4 = vpop.xlane.xlu0 %52 }
  0x81   :  { %v54_v5 = vsub.f32 %v48_v0, %v53_v4 }
  0x83   :  { %v55_v6 = vmul.f32 1.442695, %v54_v5 }
  0x85   :  { %191 = vpow2.f32 %v55_v6 }
  0x88   :  { %v77_v7 = vpop.xlane.xlu0 %76 }
  0x89   :  { %v78_v8 = vsub.f32 %v49_v2, %v77_v7 }
  0x8b   :  { %v192_v9 = vpop.eup %191  ;;  %v79_v10 = vmul.f32 1.442695, %v78_v8 }
  0x8c   :  { %v57_v11 = vsel %vm50_vm0, %v192_v9, 0.0 }
  0x8d   :  { %58 = vadd.xlane.f32.xlu1 %v57_v11  ;;  %193 = vpow2.f32 %v79_v10 }
  0x93   :  { %v194_v12 = vpop.eup %193 }
  0x94   :  { %v81_v13 = vsel %vm50_vm0, %v194_v12, 0.0 }
  0x95   :  { %82 = vadd.xlane.f32.xlu1 %v81_v13  ;;  %v145_v13 = vlaneseq }
  0x97   :  { %v146_v14 = vand.u32 127, %v145_v13 }
  0x99   :  { %vm149_vm11 = vcmp.eq.s32.totalorder %v146_v14, 2  ;;  %vm148_vm12 = vcmp.eq.s32.totalorder %v146_v14, 1  ;;  %vm147_vm13 = vcmp.eq.s32.totalorder %v146_v14, 0 }
 0x100   :  { %v59_v15 = vpop.xlane.xlu1 %58 }
 0x101   :  { %195 = vrcp.f32 %v59_v15  ;;  %v71_v19 = vand.u32 2147483648, %v59_v15  ;;  %v69_v21 = vand.u32 2147483647, %v59_v15  ;;  %vm65_vm4 = vweird.f32 %v59_v15 }
 0x103   :  { %v72_v23 = vor.u32 1.1754944e-38, %v71_v19  ;;  %vm70_vm6 = vcmp.eq.f32.partialorder %v69_v21, 8.507059e+37 }
 0x107   :  { %v196_v16 = vpop.eup %195 }
 0x108   :  { %v61_v17 = vmul.f32 %v196_v16, %v59_v15  ;;  %vm66_vm3 = vweird.f32 %v196_v16  ;;  %v83_v45 = vpop.xlane.xlu1 %82 }
 0x109   :  { %vm67_vm5 = vmor %vm65_vm4, %vm66_vm3  ;;  %vm93_vm7 = vweird.f32 %v83_v45  ;;  %v99_v50 = vand.u32 2147483648, %v83_v45  ;;  %v97_v52 = vand.u32 2147483647, %v83_v45 }
 0x10a   :  { %v62_v18 = vsub.f32 1.0, %v61_v17 }
 0x10b   :  { %v100_v53 = vor.u32 1.1754944e-38, %v99_v50  ;;  %vm98_vm10 = vcmp.eq.f32.partialorder %v97_v52, 8.507059e+37 }
 0x10c   :  { %v63_v20 = vmul.f32 %v196_v16, %v62_v18 }
 0x10e   :  { %v64_v22 = vadd.f32 %v196_v16, %v63_v20 }
 0x110   :  { %v68_v24 = vsel %vm67_vm5, %v196_v16, %v64_v22 }
 0x111   :  { %v73_v25 = vsel %vm70_vm6, %v72_v23, %v68_v24 }
 0x112   :  { %v74_v26 = vmul.f32 %v192_v9, %v73_v25 }
 0x114   :  { %v84_v27 = vmul.f32 %v194_v12, %v74_v26  ;;  %v117_v28 = vsel %vm50_vm0, %v74_v26, 0.0 }
 0x115   :  { %v118_v29 = vrot.slane %v117_v28, 4 }
 0x116   :  { %v85_v30 = vsel %vm50_vm0, %v84_v27, 0.0 }
 0x117   :  { %v119_v31 = vadd.f32 %v118_v29, %v117_v28  ;;  %86 = vadd.xlane.f32.xlu2 %v85_v30 }
 0x119   :  { %v120_v32 = vrot.slane %v119_v31, 2 }
 0x11b   :  { %v121_v33 = vadd.f32 %v120_v32, %v119_v31 }
 0x11d   :  { %v122_v34 = vrot.slane %v121_v33, 1 }
 0x11f   :  { %v123_v36 = vadd.f32 %v122_v34, %v121_v33 }
 0x121   :  { %v124_v37 = vadd.f32 %v123_v36, %v116_v35 }
 0x123   :  { %126 = vst.msk [vmem:[#allocation2] sm:$0x1] %vm44_vm1, %v124_v37 }
 0x12a   :  { %v133_v38 = vld [vmem:[#allocation2] sm:$0x1] }
 0x12b   :  { %v134_v39 = vmul.f32 0.125, %v133_v38 }
 0x12d   :  { %v135_v40 = vmax.f32 %v134_v39, 1e-08 }
 0x12f   :  { %197 = vlog2.f32 %v135_v40 }
 0x130   :  { %199 = vrcp.f32 %v83_v45 }
 0x135   :  { %v198_v41 = vpop.eup %197 }
 0x136   :  { %v137_v42 = vmul.f32 0.6931472, %v198_v41  ;;  %v200_v46 = vpop.eup %199 }
 0x137   :  { %v89_v47 = vmul.f32 %v200_v46, %v83_v45  ;;  %vm94_vm8 = vweird.f32 %v200_v46 }
 0x138   :  { %v138_v43 = vmul.f32 %v137_v42, %v135_v40  ;;  %vm95_vm9 = vmor %vm93_vm7, %vm94_vm8 }
 0x139   :  { %v90_v48 = vsub.f32 1.0, %v89_v47 }
 0x13a   :  { %v139_v44 = vsel %vm44_vm1, %v138_v43, 0.0 }
 0x13b   :  { %140 = vadd.xlane.f32.xlu2 %v139_v44  ;;  %v91_v49 = vmul.f32 %v200_v46, %v90_v48 }
 0x13d   :  { %v92_v51 = vadd.f32 %v200_v46, %v91_v49 }
 0x13f   :  { %v96_v54 = vsel %vm95_vm9, %v200_v46, %v92_v51 }
 0x140   :  { %v101_v56 = vsel %vm98_vm10, %v100_v53, %v96_v54 }
 0x18a   :  { %v87_v55 = vpop.xlane.xlu2 %86 }
 0x18b   :  { %v102_v57 = vmul.f32 %v101_v56, %v87_v55 }
 0x18d   :  { %201 = vlog2.f32 %v102_v57 }
 0x193   :  { %v202_v59 = vpop.eup %201 }
 0x194   :  { %v104_v60 = vmul.f32 0.6931472, %v202_v59 }
 0x196   :  { %v105_v61 = vmax.f32 %v104_v60, -100.0 }
 0x198   :  { %v107_v62 = vrot.slane %v105_v61, 4 }
 0x19a   :  { %v108_v63 = vadd.f32 %v107_v62, %v105_v61 }
 0x19c   :  { %v109_v0 = vrot.slane %v108_v63, 2 }
 0x19e   :  { %v110_v1 = vadd.f32 %v109_v0, %v108_v63 }
 0x1a0   :  { %v111_v2 = vrot.slane %v110_v1, 1 }
 0x1a2   :  { %v112_v4 = vadd.f32 %v111_v2, %v110_v1 }
 0x1a4   :  { %v113_v5 = vadd.f32 %v112_v4, %v106_v3 }
 0x1a6   :  { %115 = vst.msk [vmem:[#allocation3] sm:$0x1] %vm46_vm2, %v113_v5 }
 0x1ad   :  { %v130_v6 = vld [vmem:[#allocation3] sm:$0x1] }
 0x1ae   :  { %v131_v7 = vmul.f32 0.125, %v130_v6  ;;  %v141_v8 = vpop.xlane.xlu2 %140 }
 0x1af   :  { %v142_v9 = vsub.f32 0.0, %v141_v8 }
 0x1b0   :  { %v132_v10 = vsub.f32 0.0, %v131_v7 }
 0x1b1   :  { %v143_v11 = vmul.f32 2.0, %v142_v9  ;;  %v150_v18 = vsel %vm149_vm11, %v142_v9, 0.0 }
 0x1b2   :  { %153 = vperm.xlu0 %189, %v132_v10  }
 0x1b3   :  { %v144_v12 = vsub.f32 %v132_v10, %v143_v11 }
 0x1b5   :  { %160 = vperm.xlu1 %190, %v144_v12  }
 0x224   :  { %v154_v15 = vpop.permute.xlu0 %153 }
 0x225   :  { %v156_v16 = vperm.slane %v154_v15, 0 }
 0x227   :  { %v161_v17 = vpop.permute.xlu1 %160  ;;  %v157_v20 = vsel %vm148_vm12, %v156_v16, %v150_v18 }
 0x228   :  { %v163_v19 = vperm.slane %v161_v17, 0 }
 0x22a   :  { %v164_v21 = vsel %vm147_vm13, %v163_v19, %v157_v20 }
 0x22b   :  { %165 = vst [vmem:[#allocation9] sm:$0x1] %v164_v21 }
 0x22c   :  { %176 = dma.vmem_to_hbm [thread:$0]  %s172_s1, 16, %s174_s21, [#allocation6]  }
 0x22d   :  { %279 = dma.done.wait [#allocation6], 16  }
 0x22e   :  { %280 = vsyncadd [#allocation6], 4294967280 }
 0x22f   :  { %181 = vsyncpa [#allocation5], 1 }
 0x230   :  { %182 = vsyncpa [#allocation8], 1 }
 0x231   :  { %183 = vsyncpa [#allocation6], 1 }

</bundles_post_ra>
